<compile_context>
chip_gen: v7x
topology: tpu7x:2x2x1
jax: 0.10.0
libtpu: 0.0.40
codegen_flags: <defaults>
</compile_context>

<pallas_src>
import functools

import jax
import jax.numpy as jnp
from jax import lax
from jax.experimental import pallas as pl
from jax.experimental.pallas import tpu as pltpu

LANE = 128
MAX_ROW_TILE = 4096          # up to 2 MiB per f32 input block


def _num_tensorcores_per_chip():
    """Best-effort TensorCores-per-chip (2 on v7x, 1 on v5e/v6e)."""
    try:
        info = pltpu.get_tpu_info()
        for attr in ("num_cores", "num_tensorcores", "tensorcores_per_chip",
                     "core_count"):
            v = getattr(info, attr, None)
            if isinstance(v, int) and 1 <= v <= 8:
                return v
    except Exception:
        pass
    try:
        kind = jax.devices()[0].device_kind.lower()
        if "v7" in kind:
            return 2
    except Exception:
        pass
    return 1


def _accumulate(acc_ref, loss):
    """acc_ref (8,128) += vreg-wise reduction of loss (rows_blk,128). Pure VPU."""
    rows_blk = loss.shape[0]
    n8 = (rows_blk // 8) * 8
    if n8:
        acc_ref[...] += jnp.sum(loss[:n8].reshape(n8 // 8, 8, LANE), axis=0)
    rem = rows_blk - n8
    if rem:   # only for small single-block inputs (rows not a multiple of 8)
        acc_ref[0:rem, :] += loss[n8:, :]


def _quantile_loss_kernel(y_ref, yp_ref, out_ref, acc_ref, *,
                          quantile, rows, row_tile, inner, first_masked_block):
    s = pl.program_id(0)            # parallel split (per-TensorCore on v7x)
    j = pl.program_id(1)            # sequential reduction step
    nj = pl.num_programs(1)

    @pl.when(j == 0)
    def _():
        acc_ref[...] = jnp.zeros_like(acc_ref)

    # Cast to f32 in-kernel (inputs were DMA'd in native dtype).
    r = y_ref[...].astype(jnp.float32) - yp_ref[...].astype(jnp.float32)
    # Pinball loss: q*r - min(r, 0)  ==  max((q-1)*r, q*r)
    loss = quantile * r - jnp.minimum(r, jnp.float32(0.0))

    global_block = s * inner + j

    if first_masked_block is None:
        # Trace-time fast path: every block is fully interior -> no mask work.
        _accumulate(acc_ref, loss)
    else:
        @pl.when(global_block < first_masked_block)
        def _():
            _accumulate(acc_ref, loss)

        @pl.when(global_block >= first_masked_block)
        def _():
            # Partial last row-block and clamped overhang blocks: discard rows
            # past the true row count (also discards unspecified DMA padding).
            row0 = global_block * row_tile
            ridx = row0 + lax.broadcasted_iota(jnp.int32, loss.shape, 0)
            _accumulate(acc_ref, jnp.where(ridx < rows, loss, jnp.float32(0.0)))

    @pl.when(j == nj - 1)
    def _():
        out_ref[...] = acc_ref[...]     # (8,128) partial sum for this split


def quantile_loss(y, y_pred, quantile, *, block_rows=MAX_ROW_TILE,
                  num_splits=None):
    """Pallas TPU implementation of QuantileLoss.forward. Returns a scalar.

    `quantile` must be a static Python float (it is baked into the kernel).
    """
    assert y.shape == y_pred.shape
    q = float(quantile)
    n = y.size

    y_flat = jnp.ravel(y)
    yp_flat = jnp.ravel(y_pred)

    n_aligned = (n // LANE) * LANE
    tail = n - n_aligned

    # Ragged tail (< 128 elements): plain jnp in the wrapper — no full-array
    # pad copy, no per-step lane masking inside the kernel.
    if tail:
        rt = (y_flat[n_aligned:].astype(jnp.float32)
              - yp_flat[n_aligned:].astype(jnp.float32))
        tail_sum = jnp.sum(q * rt - jnp.minimum(rt, jnp.float32(0.0)))
    else:
        tail_sum = jnp.float32(0.0)

    if n_aligned == 0:                       # tiny input: pure-jnp fallback
        return tail_sum / jnp.float32(n)

    rows = n_aligned // LANE
    # TODO(synk): for non-128-aligned sizes the prefix slice may still cost one
    # copy per input; a manual-DMA (memory_space=pl.ANY) path would be zero-copy.
    y2d = (y_flat[:n_aligned] if tail else y_flat).reshape(rows, LANE)
    yp2d = (yp_flat[:n_aligned] if tail else yp_flat).reshape(rows, LANE)

    # Block shape: full rows if small, else a multiple-of-8 row tile.
    if rows <= block_rows:
        row_tile = rows
    else:
        row_tile = max(8, (int(block_rows) // 8) * 8)
    total_blocks = pl.cdiv(rows, row_tile)

    if num_splits is None:
        num_splits = _num_tensorcores_per_chip()
    nsplit = max(1, min(int(num_splits), total_blocks))
    inner = pl.cdiv(total_blocks, nsplit)

    needs_row_mask = (rows % row_tile) != 0
    has_overhang = (nsplit * inner) != total_blocks
    if not needs_row_mask and not has_overhang:
        first_masked_block = None            # no mask codegen at all
    elif needs_row_mask:
        first_masked_block = rows // row_tile
    else:
        first_masked_block = total_blocks    # only overhang blocks masked

    if has_overhang:
        def in_map(s, j):
            # Clamp so overhang-block DMAs stay in bounds; contribution masked.
            return (jnp.minimum(s * inner + j, total_blocks - 1), 0)
    else:
        def in_map(s, j):
            return (s * inner + j, 0)

    kernel = functools.partial(
        _quantile_loss_kernel,
        quantile=q,
        rows=rows,
        row_tile=row_tile,
        inner=inner,
        first_masked_block=first_masked_block,
    )

    partials = pl.pallas_call(
        kernel,
        out_shape=jax.ShapeDtypeStruct((nsplit, 8, LANE), jnp.float32),
        grid_spec=pltpu.PrefetchScalarGridSpec(
            num_scalar_prefetch=0,
            grid=(nsplit, inner),
            in_specs=[
                pl.BlockSpec((row_tile, LANE), in_map),
                pl.BlockSpec((row_tile, LANE), in_map),
            ],
            out_specs=pl.BlockSpec((None, 8, LANE), lambda s, j: (s, 0, 0)),
            scratch_shapes=[pltpu.VMEM((8, LANE), jnp.float32)],
        ),
        compiler_params=pltpu.CompilerParams(
            dimension_semantics=("parallel", "arbitrary"),
            vmem_limit_bytes=32 * 1024 * 1024,
        ),
    )(y2d, yp2d)

    # Combine per-split partial sums; divide by the TRUE element count.
    return (jnp.sum(partials) + tail_sum) / jnp.float32(n)


def _reference(y, y_pred, quantile):
    residual = y.astype(jnp.float32) - y_pred.astype(jnp.float32)
    loss = jnp.maximum((quantile - 1.0) * residual, quantile * residual)
    return jnp.mean(loss)


if __name__ == "__main__":
    key = jax.random.PRNGKey(0)
    k1, k2, k3, k4, k5, k6 = jax.random.split(key, 6)

    # 1) Small, 128-aligned (batch=2, seq=8, hidden=32): fast no-mask path,
    #    single block with non-multiple-of-8 rows.
    y1 = jax.random.normal(k1, (2, 8, 32), dtype=jnp.float32)
    p1 = jax.random.normal(k2, (2, 8, 32), dtype=jnp.float32)
    o1 = jax.block_until_ready(quantile_loss(y1, p1, 0.9))
    r1 = _reference(y1, p1, 0.9)
    assert jnp.allclose(o1, r1, rtol=1e-5, atol=1e-6), (o1, r1)

    # 2) Ragged, multi-block, forced 2-way split: exercises the partial-block
    #    mask, the clamped overhang block, and the jnp tail path.
    y2 = jax.random.normal(k3, (3, 700, 129), dtype=jnp.float32)
    p2 = jax.random.normal(k4, (3, 700, 129), dtype=jnp.float32)
    o2 = jax.block_until_ready(
        quantile_loss(y2, p2, 0.3, block_rows=512, num_splits=2))
    r2 = _reference(y2, p2, 0.3)
    assert jnp.allclose(o2, r2, rtol=1e-4, atol=1e-6), (o2, r2)

    # 3) bf16 inputs, aligned, multi-block, auto split (in-kernel f32 cast).
    y3 = jax.random.normal(k5, (4, 64, 128), dtype=jnp.bfloat16)
    p3 = jax.random.normal(k6, (4, 64, 128), dtype=jnp.bfloat16)
    o3 = jax.block_until_ready(quantile_loss(y3, p3, 0.5, block_rows=64))
    r3 = _reference(y3, p3, 0.5)
    assert jnp.allclose(o3, r3, rtol=1e-4, atol=1e-5), (o3, r3)

    # 4) Tiny (< 128 elements): pure-jnp fallback path.
    y4 = jax.random.normal(k1, (3, 5), dtype=jnp.float32)
    p4 = jax.random.normal(k2, (3, 5), dtype=jnp.float32)
    o4 = jax.block_until_ready(quantile_loss(y4, p4, 0.7))
    r4 = _reference(y4, p4, 0.7)
    assert jnp.allclose(o4, r4, rtol=1e-5, atol=1e-6), (o4, r4)

    print("KERNEL_OK")
</pallas_src>

<mosaic_0001>
module attributes {stable_mosaic.version = 11 : i64} {
  func.func @_quantile_loss_kernel(%arg0: i32, %arg1: i32, %arg2: memref<4x128xf32, #tpu.memory_space<vmem>>, %arg3: memref<4x128xf32, #tpu.memory_space<vmem>>, %arg4: memref<1x8x128xf32, #tpu.memory_space<vmem>>, %arg5: memref<8x128xf32, #tpu.memory_space<vmem>>) attributes {dimension_semantics = [#tpu.dimension_semantics<parallel>, #tpu.dimension_semantics<arbitrary>], iteration_bounds = array<i64: 1, 1>, scalar_prefetch = 0 : i64, scratch_operands = 1 : i64, tpu.core_type = #tpu.core_type<tc>, window_params = [{transform_indices = @transform_0, window_bounds = array<i64: 4, 128>}, {transform_indices = @transform_1, window_bounds = array<i64: 4, 128>}, {transform_indices = @transform_2, window_bounds = array<i64: 1, 8, 128>}]} {
    %c0_i32 = arith.constant 0 : i32
    %0 = arith.cmpi eq, %arg1, %c0_i32 : i32
    %1 = arith.extui %0 : i1 to i32
    %c0_i32_0 = arith.constant 0 : i32
    %2 = arith.cmpi ne, %1, %c0_i32_0 : i32
    scf.if %2 {
      %cst_11 = arith.constant 0.000000e+00 : f32
      %17 = vector.broadcast %cst_11 : f32 to vector<8x128xf32>
      %c0_12 = arith.constant 0 : index
      %c0_13 = arith.constant 0 : index
      %18 = vector.load %arg5[%c0_12, %c0_13] : memref<8x128xf32, #tpu.memory_space<vmem>>, vector<8x128xf32>
      tpu.vector_store %arg5[%c0_12, %c0_13], %17 {strides = array<i32>} : memref<8x128xf32, #tpu.memory_space<vmem>>, vector<8x128xf32>,
    } else {
    }
    %c0 = arith.constant 0 : index
    %c0_1 = arith.constant 0 : index
    %3 = vector.load %arg2[%c0, %c0_1] : memref<4x128xf32, #tpu.memory_space<vmem>>, vector<4x128xf32>
    %c0_2 = arith.constant 0 : index
    %c0_3 = arith.constant 0 : index
    %4 = vector.load %arg3[%c0_2, %c0_3] : memref<4x128xf32, #tpu.memory_space<vmem>>, vector<4x128xf32>
    %5 = arith.subf %3, %4 : vector<4x128xf32>
    %cst = arith.constant 0.899999976 : f32
    %6 = vector.broadcast %cst : f32 to vector<4x128xf32>
    %7 = arith.mulf %6, %5 : vector<4x128xf32>
    %cst_4 = arith.constant 0.000000e+00 : f32
    %8 = vector.broadcast %cst_4 : f32 to vector<4x128xf32>
    %9 = arith.minimumf %5, %8 : vector<4x128xf32>
    %10 = arith.subf %7, %9 : vector<4x128xf32>
    %c0_5 = arith.constant 0 : index
    %c0_6 = arith.constant 0 : index
    %11 = vector.load %arg5[%c0_5, %c0_6] : memref<8x128xf32, #tpu.memory_space<vmem>>, vector<4x128xf32>
    %12 = arith.addf %11, %10 : vector<4x128xf32>
    %c0_7 = arith.constant 0 : index
    %c0_8 = arith.constant 0 : index
    %13 = vector.load %arg5[%c0_7, %c0_8] : memref<8x128xf32, #tpu.memory_space<vmem>>, vector<4x128xf32>
    tpu.vector_store %arg5[%c0_7, %c0_8], %12 {strides = array<i32>} : memref<8x128xf32, #tpu.memory_space<vmem>>, vector<4x128xf32>,
    %c0_i32_9 = arith.constant 0 : i32
    %14 = arith.cmpi eq, %arg1, %c0_i32_9 : i32
    %15 = arith.extui %14 : i1 to i32
    %c0_i32_10 = arith.constant 0 : i32
    %16 = arith.cmpi ne, %15, %c0_i32_10 : i32
    scf.if %16 {
      %c0_11 = arith.constant 0 : index
      %c0_12 = arith.constant 0 : index
      %17 = vector.load %arg5[%c0_11, %c0_12] : memref<8x128xf32, #tpu.memory_space<vmem>>, vector<8x128xf32>
      %c0_13 = arith.constant 0 : index
      %c0_14 = arith.constant 0 : index
      %c0_15 = arith.constant 0 : index
      %18 = vector.load %arg4[%c0_13, %c0_14, %c0_15] : memref<1x8x128xf32, #tpu.memory_space<vmem>>, vector<1x8x128xf32>
      %19 = vector.shape_cast %18 : vector<1x8x128xf32> to vector<8x128xf32>
      %20 = vector.shape_cast %17 : vector<8x128xf32> to vector<1x8x128xf32>
      tpu.vector_store %arg4[%c0_13, %c0_14, %c0_15], %20 {strides = array<i32>} : memref<1x8x128xf32, #tpu.memory_space<vmem>>, vector<1x8x128xf32>,
    } else {
    }
    return
  }
  func.func @transform_0(%arg0: i32, %arg1: i32) -> (i32, i32) {
    %c1_i32 = arith.constant 1 : i32
    %0 = arith.muli %arg0, %c1_i32 : i32
    %1 = arith.addi %0, %arg1 : i32
    %c0_i32 = arith.constant 0 : i32
    %c0_i32_0 = arith.constant 0 : i32
    return %1, %c0_i32 : i32, i32
  }
  func.func @transform_1(%arg0: i32, %arg1: i32) -> (i32, i32) {
    %c1_i32 = arith.constant 1 : i32
    %0 = arith.muli %arg0, %c1_i32 : i32
    %1 = arith.addi %0, %arg1 : i32
    %c0_i32 = arith.constant 0 : i32
    %c0_i32_0 = arith.constant 0 : i32
    return %1, %c0_i32 : i32, i32
  }
  func.func @transform_2(%arg0: i32, %arg1: i32) -> (i32, i32, i32) {
    %c0_i32 = arith.constant 0 : i32
    %c0_i32_0 = arith.constant 0 : i32
    %c0_i32_1 = arith.constant 0 : i32
    return %arg0, %c0_i32, %c0_i32_0 : i32, i32, i32
  }
}

</mosaic_0001>

<bundles_post_ra>
// kernel: tpu_custom_call.1
= control target key start
LH: loop header
LB: loop body
LE: loop exit
PB: predicated region body
PF: predicated region fallthrough
CT: control target
= control target key end

     0   :  { %7 = vsyncpa [#allocation4], 0  ;;  %s210_s0 = inlined_call_operand.hbm [shape: f32[4,128], index: 0, kind: input, shape index: {}]   ;;  %s211_s1 = inlined_call_operand.hbm [shape: f32[4,128], index: 1, kind: input, shape index: {}]   ;;  %s212_s2 = inlined_call_operand.hbm [shape: f32[1,8,128], index: 2, kind: output, shape index: {}]  }
   0x1   :  { %8 = vsyncpa [#allocation7], 0 }
   0x2   :  { %9 = vsyncpa [#allocation5], 0  ;;  %s155_s9 = smov [#allocation3]   ;;  %s156_s11 = smov [#allocation6]  }
   0x3   :  { %s19_s10 = sshll.u32 %s155_s9, 4  ;;  %s32_s12 = sshll.u32 %s156_s11, 4  ;;  %s20_s10 = int_to_ptr.vmem [resolvable:$true] %s19_s10  ;;  %s33_s12 = int_to_ptr.vmem [resolvable:$true] %s32_s12 }
   0x4   :  { %s83_s15 = scalar_lea.hbm %s210_s0, 64 }
   0x5   :  { %p84_p0 = scmp.ne.s32.totalorder %s210_s0, %s83_s15  ;;  %p87_p1 = scmp.lt.u32.totalorder %s83_s15, %s210_s0 }
   0x7   :  { %p89_p2 = pnand %p87_p1, %p84_p0 }
   0x9   :  { %92 = shalt.err (!%p89_p2)
}
   0xa   :  { %s93_s20 = scalar_lea.vmem %s20_s10, 64  ;;  %p98_p4 = scmp.lt.s32.totalorder %s20_s10, %s20_s10 }
   0xb   :  { %p94_p3 = scmp.ne.s32.totalorder %s20_s10, %s93_s20  ;;  %p99_p5 = scmp.lt.s32.totalorder %s93_s20, %s93_s20 }
   0xd   :  { %p100_p6 = por %p99_p5, %p98_p4 }
   0xf   :  { %p101_p7 = pnand %p100_p6, %p94_p3 }
  0x11   :  { %104 = shalt.err (!%p101_p7)
}
  0x12   :  { %22 = dma.hbm_to_vmem [thread:$0]  %s210_s0, 64, %s20_s10, [#allocation4]  }
  0x13   :  { %s105_s25 = scalar_lea.hbm %s211_s1, 64 }
  0x14   :  { %p106_p8 = scmp.ne.s32.totalorder %s211_s1, %s105_s25  ;;  %p109_p9 = scmp.lt.u32.totalorder %s105_s25, %s211_s1 }
  0x16   :  { %p111_p10 = pnand %p109_p9, %p106_p8 }
  0x18   :  { %114 = shalt.err (!%p111_p10)
}
  0x19   :  { %s115_s30 = scalar_lea.vmem %s33_s12, 64  ;;  %p120_p12 = scmp.lt.s32.totalorder %s33_s12, %s33_s12 }
  0x1a   :  { %p116_p11 = scmp.ne.s32.totalorder %s33_s12, %s115_s30  ;;  %p121_p13 = scmp.lt.s32.totalorder %s115_s30, %s115_s30 }
  0x1c   :  { %p122_p0 = por %p121_p13, %p120_p12 }
  0x1e   :  { %p123_p1 = pnand %p122_p0, %p116_p11 }
  0x20   :  { %126 = shalt.err (!%p123_p1)
}
  0x21   :  { %35 = dma.hbm_to_vmem [thread:$0]  %s211_s1, 64, %s33_s12, [#allocation7]  }
  0x22   :  { %149 = dma.done.wait [#allocation4], 64  }
  0x23   :  { %150 = vsyncadd [#allocation4], 4294967232 }
  0x24   :  { %151 = dma.done.wait [#allocation7], 64  }
  0x25   :  { %152 = vsyncadd [#allocation7], 4294967232  ;;  %v157_v0 = vmov 0.0   ;;  %v49_v1 = vld [vmem:[#allocation3] sm:$0xf]  ;;  %s158_s4 = smov [#allocation8]  }
  0x26   :  { %48 = vst [vmem:[#allocation2] sm:$0xff] %v157_v0  ;;  %v50_v2 = vld [vmem:[#allocation6] sm:$0xf]  ;;  %s69_s5 = sshll.u32 %s158_s4, 4  ;;  %s70_s5 = int_to_ptr.vmem [resolvable:$true] %s69_s5 }
  0x27   :  { %v51_v3 = vsub.f32 %v49_v1, %v50_v2  ;;  %s127_s1 = scalar_lea.vmem %s70_s5, 128  ;;  %p132_p3 = scmp.lt.s32.totalorder %s70_s5, %s70_s5 }
  0x28   :  { %p128_p2 = scmp.ne.s32.totalorder %s70_s5, %s127_s1  ;;  %p133_p4 = scmp.lt.s32.totalorder %s127_s1, %s127_s1 }
  0x29   :  { %v52_v4 = vmul.f32 0.9, %v51_v3  ;;  %v53_v5 = vmin.f32 %v51_v3, 0.0 }
  0x2a   :  { %p134_p5 = por %p133_p4, %p132_p3 }
  0x2b   :  { %v54_v7 = vsub.f32 %v52_v4, %v53_v5 }
  0x2c   :  { %p135_p6 = pnand %p134_p5, %p128_p2 }
  0x2d   :  { %v55_v6 = vld [vmem:[#allocation2] sm:$0xf] }
  0x2e   :  { %v56_v8 = vadd.f32 %v55_v6, %v54_v7 }
  0x30   :  { %57 = vst [vmem:[#allocation2] sm:$0xf] %v56_v8 }
  0x37   :  { %v61_v9 = vld [vmem:[#allocation2] sm:$0xff] }
  0x38   :  { %62 = vst [vmem:[#allocation8] sm:$0xff] %v61_v9 }
  0x39   :  { %138 = shalt.err (!%p135_p6)
}
  0x3a   :  { %s139_s8 = scalar_lea.hbm %s212_s2, 128 }
  0x3b   :  { %p140_p7 = scmp.ne.s32.totalorder %s212_s2, %s139_s8  ;;  %p143_p8 = scmp.lt.u32.totalorder %s139_s8, %s212_s2 }
  0x3d   :  { %p145_p9 = pnand %p143_p8, %p140_p7 }
  0x3f   :  { %148 = shalt.err (!%p145_p9)
}
  0x40   :  { %72 = dma.vmem_to_hbm [thread:$0]  %s70_s5, 128, %s212_s2, [#allocation5]  }
  0x41   :  { %153 = dma.done.wait [#allocation5], 128  }
  0x42   :  { %154 = vsyncadd [#allocation5], 4294967168 }
  0x43   :  { %76 = vsyncpa [#allocation4], 1 }
  0x44   :  { %77 = vsyncpa [#allocation7], 1 }
  0x45   :  { %78 = vsyncpa [#allocation5], 1 }

</bundles_post_ra>
